<compile_context>
chip_gen: v5e
topology: v5e:2x2
jax: 0.10.0
libtpu: 0.0.40
codegen_flags: <defaults>
</compile_context>

<pallas_src>
import functools

import jax
import jax.numpy as jnp
from jax import lax
from jax.experimental import pallas as pl
from jax.experimental.pallas import tpu as pltpu  # noqa: F401  (TPU backend assumed)

INP_DIM = 3                   # 2 keypoint coords + 1 score
LAYERS = (32, 64)             # hidden widths of the MLP
FEATURE_DIM = 32              # output feature dim
CHANNELS = (INP_DIM,) + LAYERS + (FEATURE_DIM,)
IN_EPS = 1e-5                 # nn.InstanceNorm1d default eps


def _keypoint_encoder_kernel(n_layers, x_ref, avg_ref, *param_and_out_refs):
    """param_and_out_refs = (w0, b0, w1, b1, ..., w{L-1}, b{L-1}, o_ref)."""
    o_ref = param_and_out_refs[-1]
    param_refs = param_and_out_refs[:-1]

    avg = avg_ref[...]          # (B*N, B*N) block-diagonal averaging matrix (1/N)
    h = x_ref[...]              # (C0, B*N)  lane-dense activations

    for i in range(n_layers):   # static unroll over MLP layers
        w = param_refs[2 * i][...]          # (Cout, Cin)
        b = param_refs[2 * i + 1][...]      # (Cout, 1)  broadcasts along lanes
        # 1x1 Conv1d over ALL batches at once: one MXU matmul.
        h = jnp.dot(w, h, preferred_element_type=jnp.float32) + b
        if i < n_layers - 1:
            # InstanceNorm1d (affine=False): per-(batch, channel) stats over the
            # N keypoints.  `avg` is block-diagonal, so h @ avg yields, at every
            # lane, that lane's batch mean — reduce + broadcast fused in one
            # full-width MXU matmul; the lane axis is never reshaped.
            mean = jnp.dot(h, avg, preferred_element_type=jnp.float32)      # (C, B*N)
            c = h - mean
            var = jnp.dot(c * c, avg, preferred_element_type=jnp.float32)   # (C, B*N)
            h = jnp.maximum(c * lax.rsqrt(var + IN_EPS), 0.0)               # EUP + ReLU
    o_ref[...] = h


def keypoint_encoder(kpts, scores, params):
    """kpts: (B, N, 2), scores: (B, N) -> (B, FEATURE_DIM, N)."""
    B, N, _ = kpts.shape
    BN = B * N
    n_layers = len(params)

    # torch.cat([kpts.transpose(1, 2), scores.unsqueeze(1)], dim=1) -> (B, C0, N)
    x = jnp.concatenate([jnp.transpose(kpts, (0, 2, 1)), scores[:, None, :]], axis=1)
    # Lane-dense 2-D view: (C0, B*N); batch b occupies lanes [b*N, (b+1)*N).
    x2d = jnp.transpose(x, (1, 0, 2)).reshape(INP_DIM, BN).astype(jnp.float32)

    # Static block-diagonal averaging matrix: avg[i, j] = (i//N == j//N) / N.
    lane_batch = jnp.arange(BN, dtype=jnp.int32) // N
    avg = (lane_batch[:, None] == lane_batch[None, :]).astype(jnp.float32) * (1.0 / N)

    flat_params = []
    for w, b in params:
        flat_params.append(w.astype(jnp.float32))
        flat_params.append(b.reshape(-1, 1).astype(jnp.float32))   # (Cout, 1)

    kernel = functools.partial(_keypoint_encoder_kernel, n_layers)
    # Single invocation, no grid: every array is a whole-block VMEM resident.
    out2d = pl.pallas_call(
        kernel,
        out_shape=jax.ShapeDtypeStruct((FEATURE_DIM, BN), jnp.float32),
    )(x2d, avg, *flat_params)

    # (FEATURE_DIM, B*N) -> (B, FEATURE_DIM, N)
    return jnp.transpose(out2d.reshape(FEATURE_DIM, B, N), (1, 0, 2))


def init_params(key):
    """PyTorch Conv1d default init; last-layer bias = 0 (as in KeypointEncoder)."""
    params = []
    keys = jax.random.split(key, 2 * (len(CHANNELS) - 1))
    for i in range(1, len(CHANNELS)):
        fan_in = CHANNELS[i - 1]
        bound = 1.0 / (fan_in ** 0.5)
        w = jax.random.uniform(keys[2 * (i - 1)], (CHANNELS[i], CHANNELS[i - 1]),
                               jnp.float32, -bound, bound)
        b = jax.random.uniform(keys[2 * (i - 1) + 1], (CHANNELS[i],),
                               jnp.float32, -bound, bound)
        params.append((w, b))
    w_last, _ = params[-1]
    params[-1] = (w_last, jnp.zeros((CHANNELS[-1],), jnp.float32))
    return params


def reference(kpts, scores, params):
    """Pure-JAX mirror of the PyTorch forward, for verification."""
    x = jnp.concatenate([jnp.transpose(kpts, (0, 2, 1)), scores[:, None, :]], axis=1)
    n = len(params)
    for i, (w, b) in enumerate(params):
        x = jnp.einsum('oi,bin->bon', w, x) + b[None, :, None]
        if i < n - 1:
            mean = jnp.mean(x, axis=-1, keepdims=True)
            var = jnp.mean((x - mean) ** 2, axis=-1, keepdims=True)
            x = (x - mean) / jnp.sqrt(var + IN_EPS)
            x = jnp.maximum(x, 0.0)
    return x


if __name__ == "__main__":
    B, N = 2, 64          # B*N = 128 -> one fully lane-dense tile
    root = jax.random.PRNGKey(0)
    k1, k2, k3 = jax.random.split(root, 3)
    kpts = jax.random.normal(k1, (B, N, 2), jnp.float32)
    scores = jax.random.uniform(k2, (B, N), jnp.float32)
    params = init_params(k3)

    out = keypoint_encoder(kpts, scores, params)
    out = jax.block_until_ready(out)

    ref = reference(kpts, scores, params)
    assert out.shape == (B, FEATURE_DIM, N)
    max_err = float(jnp.max(jnp.abs(out - ref)))
    assert jnp.allclose(out, ref, rtol=5e-2, atol=5e-2), max_err
    print("KERNEL_OK")
</pallas_src>

<mosaic_0001>
module attributes {stable_mosaic.version = 11 : i64} {
  func.func @_keypoint_encoder_kernel(%arg0: memref<3x128xf32, #tpu.memory_space<vmem>>, %arg1: memref<128x128xf32, #tpu.memory_space<vmem>>, %arg2: memref<32x3xf32, #tpu.memory_space<vmem>>, %arg3: memref<32x1xf32, #tpu.memory_space<vmem>>, %arg4: memref<64x32xf32, #tpu.memory_space<vmem>>, %arg5: memref<64x1xf32, #tpu.memory_space<vmem>>, %arg6: memref<32x64xf32, #tpu.memory_space<vmem>>, %arg7: memref<32x1xf32, #tpu.memory_space<vmem>>, %arg8: memref<32x128xf32, #tpu.memory_space<vmem>>) attributes {dimension_semantics = [], scalar_prefetch = 0 : i64, scratch_operands = 0 : i64, tpu.core_type = #tpu.core_type<tc>} {
    %c0 = arith.constant 0 : index
    %c0_0 = arith.constant 0 : index
    %0 = vector.load %arg1[%c0, %c0_0] : memref<128x128xf32, #tpu.memory_space<vmem>>, vector<128x128xf32>
    %c0_1 = arith.constant 0 : index
    %c0_2 = arith.constant 0 : index
    %1 = vector.load %arg0[%c0_1, %c0_2] : memref<3x128xf32, #tpu.memory_space<vmem>>, vector<3x128xf32>
    %c0_3 = arith.constant 0 : index
    %c0_4 = arith.constant 0 : index
    %2 = vector.load %arg2[%c0_3, %c0_4] : memref<32x3xf32, #tpu.memory_space<vmem>>, vector<32x3xf32>
    %c0_5 = arith.constant 0 : index
    %c0_6 = arith.constant 0 : index
    %3 = vector.load %arg3[%c0_5, %c0_6] : memref<32x1xf32, #tpu.memory_space<vmem>>, vector<32x1xf32>
    %cst = arith.constant dense<0.000000e+00> : vector<32x128xf32>
    %4 = tpu.matmul %2, %1, %cst {dimension_numbers = #tpu.dot_dimension_numbers<[1], [0], [0], [1], [0, 0, 1, 1], [], []>} : vector<32x3xf32>, vector<3x128xf32>, vector<32x128xf32> -> vector<32x128xf32>
    %5 = vector.broadcast %3 : vector<32x1xf32> to vector<32x128xf32>
    %6 = arith.addf %4, %5 : vector<32x128xf32>
    %cst_7 = arith.constant dense<0.000000e+00> : vector<32x128xf32>
    %7 = tpu.matmul %6, %0, %cst_7 {dimension_numbers = #tpu.dot_dimension_numbers<[1], [0], [0], [1], [0, 0, 1, 1], [], []>} : vector<32x128xf32>, vector<128x128xf32>, vector<32x128xf32> -> vector<32x128xf32>
    %8 = arith.subf %6, %7 : vector<32x128xf32>
    %9 = arith.mulf %8, %8 : vector<32x128xf32>
    %cst_8 = arith.constant dense<0.000000e+00> : vector<32x128xf32>
    %10 = tpu.matmul %9, %0, %cst_8 {dimension_numbers = #tpu.dot_dimension_numbers<[1], [0], [0], [1], [0, 0, 1, 1], [], []>} : vector<32x128xf32>, vector<128x128xf32>, vector<32x128xf32> -> vector<32x128xf32>
    %cst_9 = arith.constant 9.99999974E-6 : f32
    %11 = vector.broadcast %cst_9 : f32 to vector<32x128xf32>
    %12 = arith.addf %10, %11 : vector<32x128xf32>
    %13 = math.rsqrt %12 : vector<32x128xf32>
    %14 = arith.mulf %8, %13 : vector<32x128xf32>
    %cst_10 = arith.constant 0.000000e+00 : f32
    %15 = vector.broadcast %cst_10 : f32 to vector<32x128xf32>
    %16 = arith.maximumf %14, %15 : vector<32x128xf32>
    %c0_11 = arith.constant 0 : index
    %c0_12 = arith.constant 0 : index
    %17 = vector.load %arg4[%c0_11, %c0_12] : memref<64x32xf32, #tpu.memory_space<vmem>>, vector<64x32xf32>
    %c0_13 = arith.constant 0 : index
    %c0_14 = arith.constant 0 : index
    %18 = vector.load %arg5[%c0_13, %c0_14] : memref<64x1xf32, #tpu.memory_space<vmem>>, vector<64x1xf32>
    %cst_15 = arith.constant dense<0.000000e+00> : vector<64x128xf32>
    %19 = tpu.matmul %17, %16, %cst_15 {dimension_numbers = #tpu.dot_dimension_numbers<[1], [0], [0], [1], [0, 0, 1, 1], [], []>} : vector<64x32xf32>, vector<32x128xf32>, vector<64x128xf32> -> vector<64x128xf32>
    %20 = vector.broadcast %18 : vector<64x1xf32> to vector<64x128xf32>
    %21 = arith.addf %19, %20 : vector<64x128xf32>
    %cst_16 = arith.constant dense<0.000000e+00> : vector<64x128xf32>
    %22 = tpu.matmul %21, %0, %cst_16 {dimension_numbers = #tpu.dot_dimension_numbers<[1], [0], [0], [1], [0, 0, 1, 1], [], []>} : vector<64x128xf32>, vector<128x128xf32>, vector<64x128xf32> -> vector<64x128xf32>
    %23 = arith.subf %21, %22 : vector<64x128xf32>
    %24 = arith.mulf %23, %23 : vector<64x128xf32>
    %cst_17 = arith.constant dense<0.000000e+00> : vector<64x128xf32>
    %25 = tpu.matmul %24, %0, %cst_17 {dimension_numbers = #tpu.dot_dimension_numbers<[1], [0], [0], [1], [0, 0, 1, 1], [], []>} : vector<64x128xf32>, vector<128x128xf32>, vector<64x128xf32> -> vector<64x128xf32>
    %cst_18 = arith.constant 9.99999974E-6 : f32
    %26 = vector.broadcast %cst_18 : f32 to vector<64x128xf32>
    %27 = arith.addf %25, %26 : vector<64x128xf32>
    %28 = math.rsqrt %27 : vector<64x128xf32>
    %29 = arith.mulf %23, %28 : vector<64x128xf32>
    %cst_19 = arith.constant 0.000000e+00 : f32
    %30 = vector.broadcast %cst_19 : f32 to vector<64x128xf32>
    %31 = arith.maximumf %29, %30 : vector<64x128xf32>
    %c0_20 = arith.constant 0 : index
    %c0_21 = arith.constant 0 : index
    %32 = vector.load %arg6[%c0_20, %c0_21] : memref<32x64xf32, #tpu.memory_space<vmem>>, vector<32x64xf32>
    %c0_22 = arith.constant 0 : index
    %c0_23 = arith.constant 0 : index
    %33 = vector.load %arg7[%c0_22, %c0_23] : memref<32x1xf32, #tpu.memory_space<vmem>>, vector<32x1xf32>
    %cst_24 = arith.constant dense<0.000000e+00> : vector<32x128xf32>
    %34 = tpu.matmul %32, %31, %cst_24 {dimension_numbers = #tpu.dot_dimension_numbers<[1], [0], [0], [1], [0, 0, 1, 1], [], []>} : vector<32x64xf32>, vector<64x128xf32>, vector<32x128xf32> -> vector<32x128xf32>
    %35 = vector.broadcast %33 : vector<32x1xf32> to vector<32x128xf32>
    %36 = arith.addf %34, %35 : vector<32x128xf32>
    %c0_25 = arith.constant 0 : index
    %c0_26 = arith.constant 0 : index
    %37 = vector.load %arg8[%c0_25, %c0_26] : memref<32x128xf32, #tpu.memory_space<vmem>>, vector<32x128xf32>
    tpu.vector_store %arg8[%c0_25, %c0_26], %36 {strides = array<i32>} : memref<32x128xf32, #tpu.memory_space<vmem>>, vector<32x128xf32>,
    return
  }
}

</mosaic_0001>

<bundles_post_ra>
// kernel: tpu_custom_call.1
= control target key start
LH: loop header
LB: loop body
LE: loop exit
PB: predicated region body
PF: predicated region fallthrough
CT: control target
= control target key end

     0   :  { %vm88_vm0 = vcmask 1042432   ;;  %v733_v3 = vmov 0   ;;  %vm75_vm1 = vcmask 23552   ;;  %s1194_s0 = inlined_call_operand.vmem [shape: f32[3,128], index: 0, kind: input, shape index: {}]   ;;  %s1195_s1 = inlined_call_operand.vmem [shape: f32[128,128], index: 1, kind: input, shape index: {}]   ;;  %s1196_s2 = inlined_call_operand.vmem [shape: f32[32,3], index: 2, kind: input, shape index: {}]   ;;  %s1197_s3 = inlined_call_operand.vmem [shape: f32[32,1], index: 3, kind: input, shape index: {}]   ;;  %s1198_s4 = inlined_call_operand.vmem [shape: f32[64,32], index: 4, kind: input, shape index: {}]   ;;  %s1199_s5 = inlined_call_operand.vmem [shape: f32[64,1], index: 5, kind: input, shape index: {}]   ;;  %s1200_s6 = inlined_call_operand.vmem [shape: f32[32,64], index: 6, kind: input, shape index: {}]   ;;  %s1201_s7 = inlined_call_operand.vmem [shape: f32[32,1], index: 7, kind: input, shape index: {}]   ;;  %s1202_s8 = inlined_call_operand.hbm [shape: f32[32,128], index: 8, kind: output, shape index: {}]  }
   0x1   :  { %v46_v0 = vld [vmem:[%s1194_s0] sm:$0x7]  ;;  %v53_v1 = vld [vmem:[%s1197_s3 + $0x10] sm:$0xff]  ;;  %681 = vset.pattern.permute.xlu1 %v733_v3  ;;  %680 = vset.pattern.permute.xlu0 %v733_v3 }
   0x2   :  { %v51_v2 = vld [vmem:[%s1197_s3] sm:$0xff]  ;;  %643 = vmatpush.msk.msra.mxu0 %vm88_vm0, %v46_v0  ;;  %67 = vperm.xlu1 %681, %v53_v1  }
   0x3   :  { %v47_v4 = vld [vmem:[%s1196_s2] sm:$0xff]  ;;  %57 = vperm.xlu0 %680, %v51_v2   ;;  %682 = vset.pattern.permute.xlu2 %v733_v3 }
   0x4   :  { %644 = vmatmul.msk.f32.vlgmr.msra.gmra.mxu0 %vm75_vm1, %v47_v4 }
   0x5   :  { %13 = vsyncpa [#allocation3], 0  ;;  %v54_v5 = vld [vmem:[%s1197_s3 + $0x18] sm:$0xff]  ;;  %v52_v6 = vld [vmem:[%s1197_s3 + $0x8] sm:$0xff]  ;;  %vm291_vm14 = vcmask 261120   ;;  %s734_s22 = smov [#allocation2]  }
   0x6   :  { %v48_v7 = vld [vmem:[%s1196_s2 + $0x8] sm:$0xff]  ;;  %v808_v8 = vld [vmem:[%s1195_s1 + $0x78] sm:$0xff]  ;;  %v813_v9 = vld [vmem:[%s1195_s1 + $0x70] sm:$0xff]  ;;  %s631_s25 = sshll.u32 %s1202_s8, 4  ;;  %s736_s26 = smov 8   ;;  %s632_s25 = int_to_ptr.hbm [resolvable:$true] %s631_s25 }
   0x7   :  { %121 = vmatpush.msra.mxu1 %v808_v8  ;;  %158 = vmatpush.msra.mxu2 %v808_v8  ;;  %v820_v10 = vld [vmem:[%s1195_s1 + $0x68] sm:$0xff]  ;;  %v246_v11 = vld [vmem:[%s1199_s5 + $0x18] sm:$0xff]  ;;  %v831_v12 = vld [vmem:[%s1195_s1 + $0x60] sm:$0xff] }
   0x8   :  { %357 = vmatpush.msrb.mxu0 %v808_v8  ;;  %v245_v13 = vld [vmem:[%s1199_s5 + $0x10] sm:$0xff]  ;;  %v845_v15 = vld [vmem:[%s1195_s1 + $0x58] sm:$0xff]  ;;  %v860_v17 = vld [vmem:[%s1195_s1 + $0x48] sm:$0xff] }
   0x9   :  { %122 = vmatpush.msra.mxu1 %v813_v9  ;;  %159 = vmatpush.msra.mxu2 %v813_v9  ;;  %v49_v14 = vld [vmem:[%s1196_s2 + $0x10] sm:$0xff]  ;;  %v871_v19 = vld [vmem:[%s1195_s1 + $0x40] sm:$0xff]  ;;  %v248_v20 = vld [vmem:[%s1199_s5 + $0x28] sm:$0xff] }
   0xa   :  { %72 = vperm.xlu1 %681, %v54_v5   ;;  %358 = vmatpush.msrb.mxu0 %v813_v9  ;;  %v853_v16 = vld [vmem:[%s1195_s1 + $0x50] sm:$0xff]  ;;  %v50_v21 = vld [vmem:[%s1196_s2 + $0x18] sm:$0xff]  ;;  %v556_v23 = vld [vmem:[%s1201_s7 + $0x8] sm:$0xff]  ;;  %s629_s2 = sshll.u32 %s734_s22, 4  ;;  %s630_s2 = int_to_ptr.vmem [resolvable:$true] %s629_s2 }
   0xb   :  { %62 = vperm.xlu0 %680, %v52_v6   ;;  %123 = vmatpush.msra.mxu1 %v820_v10  ;;  %v249_v18 = vld [vmem:[%s1199_s5 + $0x30] sm:$0xff]  ;;  %v885_v22 = vld [vmem:[%s1195_s1 + $0x38] sm:$0xff]  ;;  %v555_v24 = vld [vmem:[%s1201_s7] sm:$0xff] }
   0xc   :  { %645 = vmatmul.msk.f32.gmra.mxu0 %vm75_vm1, %v48_v7  ;;  %160 = vmatpush.msra.mxu2 %v820_v10  ;;  %v558_v25 = vld [vmem:[%s1201_s7 + $0x18] sm:$0xff]  ;;  %v909_v26 = vld [vmem:[%s1195_s1 + $0x30] sm:$0xff]  ;;  %v914_v27 = vld [vmem:[%s1195_s1 + $0x28] sm:$0xff] }
   0xd   :  { %359 = vmatpush.msrb.mxu0 %v820_v10  ;;  %124 = vmatpush.msra.mxu1 %v831_v12  ;;  %v921_v28 = vld [vmem:[%s1195_s1 + $0x20] sm:$0xff]  ;;  %v929_v29 = vld [vmem:[%s1195_s1 + $0x18] sm:$0xff]  ;;  %v940_v30 = vld [vmem:[%s1195_s1 + $0x10] sm:$0xff] }
   0xe   :  { %161 = vmatpush.msra.mxu2 %v831_v12  ;;  %v948_v31 = vld [vmem:[%s1195_s1 + $0x8] sm:$0xff]  ;;  %v956_v32 = vld [vmem:[%s1195_s1] sm:$0xff] }
   0xf   :  { %125 = vmatpush.msra.mxu1 %v845_v15  ;;  %360 = vmatpush.msrb.mxu0 %v831_v12 }
  0x10   :  { %162 = vmatpush.msra.mxu2 %v845_v15 }
  0x11   :  { %126 = vmatpush.msra.mxu1 %v853_v16  ;;  %361 = vmatpush.msrb.mxu0 %v845_v15 }
  0x12   :  { %268 = vperm.xlu1 %681, %v246_v11   ;;  %163 = vmatpush.msra.mxu2 %v853_v16 }
  0x13   :  { %263 = vperm.xlu0 %680, %v245_v13   ;;  %127 = vmatpush.msra.mxu1 %v860_v17 }
  0x14   :  { %646 = vmatmul.msk.f32.gmra.mxu0 %vm75_vm1, %v49_v14  ;;  %164 = vmatpush.msra.mxu2 %v860_v17 }
  0x15   :  { %362 = vmatpush.msrb.mxu0 %v853_v16  ;;  %128 = vmatpush.msra.mxu1 %v871_v19 }
  0x16   :  { %165 = vmatpush.msra.mxu2 %v871_v19 }
  0x17   :  { %129 = vmatpush.msra.mxu1 %v885_v22  ;;  %363 = vmatpush.msrb.mxu0 %v860_v17 }
  0x18   :  { %166 = vmatpush.msra.mxu2 %v885_v22 }
  0x19   :  { %364 = vmatpush.msrb.mxu0 %v871_v19  ;;  %130 = vmatpush.msra.mxu1 %v909_v26 }
  0x1a   :  { %283 = vperm.xlu1 %681, %v249_v18   ;;  %167 = vmatpush.msra.mxu2 %v909_v26 }
  0x1b   :  { %278 = vperm.xlu0 %680, %v248_v20   ;;  %365 = vmatpush.msrb.mxu0 %v885_v22  ;;  %v243_v20 = vld [vmem:[%s1199_s5] sm:$0xff] }
  0x1c   :  { %647 = vmatmul.msk.f32.gmra.mxu0 %vm75_vm1, %v50_v21  ;;  %131 = vmatpush.msra.mxu1 %v914_v27 }
  0x1d   :  { %366 = vmatpush.msrb.mxu0 %v909_v26  ;;  %168 = vmatpush.msra.mxu2 %v914_v27 }
  0x1e   :  { %132 = vmatpush.msra.mxu1 %v921_v28  ;;  %253 = vperm.xlu2 %682, %v243_v20  }
  0x1f   :  { %367 = vmatpush.msrb.mxu0 %v914_v27  ;;  %169 = vmatpush.msra.mxu2 %v921_v28 }
  0x20   :  { %133 = vmatpush.msra.mxu1 %v929_v29 }
  0x21   :  { %368 = vmatpush.msrb.mxu0 %v921_v28  ;;  %170 = vmatpush.msra.mxu2 %v929_v29 }
  0x22   :  { %566 = vperm.xlu1 %681, %v556_v23   ;;  %134 = vmatpush.msra.mxu1 %v940_v30 }
  0x23   :  { %561 = vperm.xlu0 %680, %v555_v24   ;;  %369 = vmatpush.msrb.mxu0 %v929_v29 }
  0x24   :  { %171 = vmatpush.msra.mxu2 %v940_v30  ;;  %135 = vmatpush.msra.mxu1 %v948_v31 }
  0x25   :  { %370 = vmatpush.msrb.mxu0 %v940_v30 }
  0x26   :  { %172 = vmatpush.msra.mxu2 %v948_v31  ;;  %136 = vmatpush.msra.mxu1 %v956_v32 }
  0x27   :  { %371 = vmatpush.msrb.mxu0 %v948_v31 }
  0x28   :  { %173 = vmatpush.msra.mxu2 %v956_v32  ;;  %414 = vmatpush.msrb.mxu1 %v808_v8 }
  0x29   :  { %372 = vmatpush.msrb.mxu0 %v956_v32 }
  0x2a   :  { %415 = vmatpush.msrb.mxu1 %v813_v9 }
  0x2b   :  { %576 = vperm.xlu0 %680, %v558_v25  }
  0x2c   :  { %416 = vmatpush.msrb.mxu1 %v820_v10 }
  0x2e   :  { %417 = vmatpush.msrb.mxu1 %v831_v12 }
  0x30   :  { %418 = vmatpush.msrb.mxu1 %v845_v15 }
  0x32   :  { %419 = vmatpush.msrb.mxu1 %v853_v16 }
  0x34   :  { %420 = vmatpush.msrb.mxu1 %v860_v17 }
  0x36   :  { %421 = vmatpush.msrb.mxu1 %v871_v19 }
  0x38   :  { %422 = vmatpush.msrb.mxu1 %v885_v22 }
  0x3a   :  { %423 = vmatpush.msrb.mxu1 %v909_v26 }
  0x3c   :  { %424 = vmatpush.msrb.mxu1 %v914_v27 }
  0x3e   :  { %425 = vmatpush.msrb.mxu1 %v921_v28 }
  0x40   :  { %426 = vmatpush.msrb.mxu1 %v929_v29 }
  0x42   :  { %427 = vmatpush.msrb.mxu1 %v940_v30 }
  0x44   :  { %428 = vmatpush.msrb.mxu1 %v948_v31 }
  0x46   :  { %429 = vmatpush.msrb.mxu1 %v956_v32 }
  0x74   :  { %v68_v39 = vpop.permute.xlu1 %67 }
  0x75   :  { %v58_v33 = vpop.permute.xlu0 %57 }
  0x7c   :  { %v73_v42 = vpop.permute.xlu1 %72 }
  0x7d   :  { %v63_v36 = vpop.permute.xlu0 %62 }
  0x81   :  { %v109_v34 = vpop.f32.mrf.mxu0 }
  0x82   :  { %v110_v35 = vadd.f32 %v109_v34, %v58_v33 }
  0x84   :  { %137 = vmatmul.f32.vlgmr.msra.gmra.mxu1 %v110_v35 }
  0x89   :  { %v112_v37 = vpop.f32.mrf.mxu0 }
  0x8a   :  { %v113_v38 = vadd.f32 %v112_v37, %v63_v36 }
  0x8c   :  { %140 = vmatmul.f32.gmra.mxu1 %v113_v38 }
  0x91   :  { %v115_v40 = vpop.f32.mrf.mxu0 }
  0x92   :  { %v116_v41 = vadd.f32 %v115_v40, %v68_v39  ;;  %v244_v40 = vld [vmem:[%s1199_s5 + $0x8] sm:$0xff] }
  0x93   :  { %258 = vperm.xlu2 %682, %v244_v40  }
  0x94   :  { %143 = vmatmul.f32.gmra.mxu1 %v116_v41 }
  0x99   :  { %v118_v43 = vpop.f32.mrf.mxu0 }
  0x9a   :  { %v119_v44 = vadd.f32 %v118_v43, %v73_v42 }
  0x9c   :  { %146 = vmatmul.f32.gmra.mxu1 %v119_v44 }
 0x101   :  { %v138_v45 = vpop.f32.mrf.mxu1 }
 0x102   :  { %v978_v46 = vsub.f32 %v110_v35, %v138_v45 }
 0x104   :  { %v154_v47 = vmul.f32 %v978_v46, %v978_v46 }
 0x106   :  { %174 = vmatmul.f32.vlgmr.msra.gmra.mxu2 %v154_v47 }
 0x109   :  { %v141_v48 = vpop.f32.mrf.mxu1 }
 0x10a   :  { %v982_v49 = vsub.f32 %v113_v38, %v141_v48 }
 0x10c   :  { %v155_v50 = vmul.f32 %v982_v49, %v982_v49 }
 0x10e   :  { %177 = vmatmul.f32.gmra.mxu2 %v155_v50 }
 0x111   :  { %v144_v51 = vpop.f32.mrf.mxu1 }
 0x112   :  { %v152_v52 = vsub.f32 %v116_v41, %v144_v51 }
 0x114   :  { %v156_v53 = vmul.f32 %v152_v52, %v152_v52 }
 0x116   :  { %180 = vmatmul.f32.gmra.mxu2 %v156_v53 }
 0x119   :  { %v147_v54 = vpop.f32.mrf.mxu1 }
 0x11a   :  { %v153_v55 = vsub.f32 %v119_v44, %v147_v54  ;;  %v247_v54 = vld [vmem:[%s1199_s5 + $0x20] sm:$0xff] }
 0x11b   :  { %273 = vperm.xlu2 %682, %v247_v54  }
 0x11c   :  { %v157_v56 = vmul.f32 %v153_v55, %v153_v55 }
 0x11e   :  { %183 = vmatmul.f32.gmra.mxu2 %v157_v56 }
 0x189   :  { %v175_v57 = vpop.f32.mrf.mxu2 }
 0x18a   :  { %v176_v60 = vadd.f32 1e-05, %v175_v57 }
 0x18c   :  { %vm193_vm12 = vweird.f32 %v176_v60 }
 0x191   :  { %v178_v58 = vpop.f32.mrf.mxu2 }
 0x192   :  { %v179_v59 = vadd.f32 1e-05, %v178_v58 }
 0x194   :  { %683 = vrsqrt.f32 %v179_v59  ;;  %vm203_vm6 = vweird.f32 %v179_v59 }
 0x195   :  { %685 = vrsqrt.f32 %v176_v60 }
 0x199   :  { %v181_v61 = vpop.f32.mrf.mxu2 }
 0x19a   :  { %v182_v62 = vadd.f32 1e-05, %v181_v61  ;;  %v684_v63 = vpop.eup %683 }
 0x19b   :  { %v686_v0 = vpop.eup %685  ;;  %v198_v1 = vmul.f32 %v684_v63, %v179_v59  ;;  %vm204_vm3 = vweird.f32 %v684_v63 }
 0x19c   :  { %687 = vrsqrt.f32 %v182_v62  ;;  %v188_v5 = vmul.f32 %v686_v0, %v176_v60  ;;  %vm213_vm4 = vweird.f32 %v182_v62  ;;  %vm194_vm8 = vweird.f32 %v686_v0  ;;  %vm205_vm10 = vmor %vm203_vm6, %vm204_vm3 }
 0x19d   :  { %v199_v7 = vmul.f32 %v684_v63, %v198_v1  ;;  %vm195_vm13 = vmor %vm193_vm12, %vm194_vm8 }
 0x19e   :  { %v189_v13 = vmul.f32 %v686_v0, %v188_v5 }
 0x19f   :  { %v200_v18 = vmul.f32 0.5, %v199_v7 }
 0x1a0   :  { %v190_v23 = vmul.f32 0.5, %v189_v13 }
 0x1a1   :  { %v184_v2 = vpop.f32.mrf.mxu2  ;;  %v201_v33 = vsub.f32 1.5, %v200_v18 }
 0x1a2   :  { %v688_v3 = vpop.eup %687  ;;  %v185_v4 = vadd.f32 1e-05, %v184_v2  ;;  %v191_v35 = vsub.f32 1.5, %v190_v23 }
 0x1a3   :  { %v208_v6 = vmul.f32 %v688_v3, %v182_v62  ;;  %vm214_vm2 = vweird.f32 %v688_v3  ;;  %v202_v39 = vmul.f32 %v684_v63, %v201_v33 }
 0x1a4   :  { %689 = vrsqrt.f32 %v185_v4  ;;  %vm215_vm7 = vmor %vm213_vm4, %vm214_vm2  ;;  %vm223_vm9 = vweird.f32 %v185_v4  ;;  %v192_v43 = vmul.f32 %v686_v0, %v191_v35 }
 0x1a5   :  { %v209_v11 = vmul.f32 %v688_v3, %v208_v6  ;;  %v206_v45 = vsel %vm205_vm10, %v684_v63, %v202_v39 }
 0x1a6   :  { %v196_v50 = vsel %vm195_vm13, %v686_v0, %v192_v43  ;;  %v228_v53 = vmul.f32 %v206_v45, %v982_v49  ;;  %v250_v49 = vld [vmem:[%s1199_s5 + $0x38] sm:$0xff] }
 0x1a7   :  { %v210_v14 = vmul.f32 0.5, %v209_v11  ;;  %v227_v57 = vmul.f32 %v196_v50, %v978_v46  ;;  %288 = vperm.xlu2 %682, %v250_v49   ;;  %v236_v46 = vld [vmem:[%s1198_s4 + $0x8] sm:$0xff] }
 0x1a8   :  { %v232_v58 = vmax.f32 %v228_v53, 0.0 }
 0x1a9   :  { %v211_v24 = vsub.f32 1.5, %v210_v14  ;;  %v231_v59 = vmax.f32 %v227_v57, 0.0 }
 0x1aa   :  { %v690_v21 = vpop.eup %689 }
 0x1ab   :  { %v218_v25 = vmul.f32 %v690_v21, %v185_v4  ;;  %v212_v37 = vmul.f32 %v688_v3, %v211_v24  ;;  %vm224_vm5 = vweird.f32 %v690_v21 }
 0x1ac   :  { %vm225_vm11 = vmor %vm223_vm9, %vm224_vm5 }
 0x1ad   :  { %v219_v34 = vmul.f32 %v690_v21, %v218_v25  ;;  %v216_v42 = vsel %vm215_vm7, %v688_v3, %v212_v37 }
 0x1ae   :  { %v229_v48 = vmul.f32 %v216_v42, %v152_v52  ;;  %v235_v52 = vld [vmem:[%s1198_s4] sm:$0xff] }
 0x1af   :  { %v220_v36 = vmul.f32 0.5, %v219_v34 }
 0x1b0   :  { %v233_v56 = vmax.f32 %v229_v48, 0.0 }
 0x1b1   :  { %v221_v38 = vsub.f32 1.5, %v220_v36 }
 0x1b3   :  { %v222_v41 = vmul.f32 %v690_v21, %v221_v38 }
 0x1b5   :  { %v226_v44 = vsel %vm225_vm11, %v690_v21, %v222_v41 }
 0x1b6   :  { %v230_v47 = vmul.f32 %v226_v44, %v153_v55  ;;  %v557_v55 = vld [vmem:[%s1201_s7 + $0x10] sm:$0xff] }
 0x1b7   :  { %571 = vperm.xlu2 %682, %v557_v55  }
 0x1b8   :  { %v234_v51 = vmax.f32 %v230_v47, 0.0 }
 0x1ba   :  { %328 = vmatpush.msra.mxu3 %v234_v51 }
 0x1bc   :  { %329 = vmatpush.msra.mxu3 %v233_v56 }
 0x1be   :  { %330 = vmatpush.msra.mxu3 %v232_v58 }
 0x1c0   :  { %331 = vmatpush.msra.mxu3 %v231_v59 }
 0x1c1   :  { %648 = vmatmul.msk.f32.vlgmr.msra.gmra.mxu3 %vm291_vm14, %v235_v52 }
 0x1c2   :  { %660 = vmatpush.msrb.mxu3 %v808_v8  ;;  %v237_v8 = vld [vmem:[%s1198_s4 + $0x10] sm:$0xff] }
 0x1c4   :  { %661 = vmatpush.msrb.mxu3 %v813_v9  ;;  %v238_v9 = vld [vmem:[%s1198_s4 + $0x18] sm:$0xff] }
 0x1c6   :  { %662 = vmatpush.msrb.mxu3 %v820_v10  ;;  %v239_v10 = vld [vmem:[%s1198_s4 + $0x20] sm:$0xff] }
 0x1c8   :  { %663 = vmatpush.msrb.mxu3 %v831_v12  ;;  %v240_v12 = vld [vmem:[%s1198_s4 + $0x28] sm:$0xff] }
 0x1c9   :  { %649 = vmatmul.msk.f32.gmra.mxu3 %vm291_vm14, %v236_v46 }
 0x1ca   :  { %664 = vmatpush.msrb.mxu3 %v845_v15  ;;  %v241_v15 = vld [vmem:[%s1198_s4 + $0x30] sm:$0xff] }
 0x1cc   :  { %665 = vmatpush.msrb.mxu3 %v853_v16  ;;  %v242_v16 = vld [vmem:[%s1198_s4 + $0x38] sm:$0xff] }
 0x1ce   :  { %666 = vmatpush.msrb.mxu3 %v860_v17  ;;  %v254_v17 = vpop.permute.xlu2 %253 }
 0x1d0   :  { %667 = vmatpush.msrb.mxu3 %v871_v19 }
 0x1d1   :  { %650 = vmatmul.msk.f32.gmra.mxu3 %vm291_vm14, %v237_v8 }
 0x1d2   :  { %668 = vmatpush.msrb.mxu3 %v885_v22 }
 0x1d4   :  { %669 = vmatpush.msrb.mxu3 %v909_v26 }
 0x1d6   :  { %670 = vmatpush.msrb.mxu3 %v914_v27  ;;  %v259_v26 = vpop.permute.xlu2 %258 }
 0x1d8   :  { %671 = vmatpush.msrb.mxu3 %v921_v28 }
 0x1d9   :  { %651 = vmatmul.msk.f32.gmra.mxu3 %vm291_vm14, %v238_v9 }
 0x1da   :  { %672 = vmatpush.msrb.mxu3 %v929_v29  ;;  %v264_v29 = vpop.permute.xlu0 %263 }
 0x1dc   :  { %673 = vmatpush.msrb.mxu3 %v940_v30 }
 0x1de   :  { %674 = vmatpush.msrb.mxu3 %v948_v31  ;;  %v274_v62 = vpop.permute.xlu2 %273 }
 0x1e0   :  { %675 = vmatpush.msrb.mxu3 %v956_v32  ;;  %v269_v32 = vpop.permute.xlu1 %268 }
 0x1e1   :  { %652 = vmatmul.msk.f32.gmra.mxu3 %vm291_vm14, %v239_v10 }
 0x1e2   :  { %v279_v1 = vpop.permute.xlu0 %278 }
 0x1e8   :  { %v284_v4 = vpop.permute.xlu1 %283 }
 0x1e9   :  { %653 = vmatmul.msk.f32.gmra.mxu3 %vm291_vm14, %v240_v12 }
 0x1f1   :  { %654 = vmatmul.msk.f32.gmra.mxu3 %vm291_vm14, %v241_v15 }
 0x1f9   :  { %655 = vmatmul.msk.f32.gmra.mxu3 %vm291_vm14, %v242_v16 }
 0x201   :  { %v289_v7 = vpop.permute.xlu2 %288 }
 0x244   :  { %v333_v19 = vpop.f32.mrf.mxu3 }
 0x245   :  { %v334_v22 = vadd.f32 %v333_v19, %v254_v17 }
 0x247   :  { %373 = vmatmul.f32.vlgmr.msrb.gmra.mxu0 %v334_v22 }
 0x24c   :  { %v336_v27 = vpop.f32.mrf.mxu3 }
 0x24d   :  { %v337_v28 = vadd.f32 %v336_v27, %v259_v26 }
 0x24f   :  { %376 = vmatmul.f32.gmra.mxu0 %v337_v28 }
 0x254   :  { %v339_v30 = vpop.f32.mrf.mxu3 }
 0x255   :  { %v340_v31 = vadd.f32 %v339_v30, %v264_v29 }
 0x257   :  { %379 = vmatmul.f32.gmra.mxu0 %v340_v31 }
 0x25c   :  { %v342_v60 = vpop.f32.mrf.mxu3 }
 0x25d   :  { %v343_v61 = vadd.f32 %v342_v60, %v269_v32 }
 0x25f   :  { %382 = vmatmul.f32.gmra.mxu0 %v343_v61 }
 0x264   :  { %v345_v63 = vpop.f32.mrf.mxu3 }
 0x265   :  { %v346_v0 = vadd.f32 %v345_v63, %v274_v62 }
 0x267   :  { %385 = vmatmul.f32.gmra.mxu0 %v346_v0 }
 0x26c   :  { %v348_v2 = vpop.f32.mrf.mxu3 }
 0x26d   :  { %v349_v3 = vadd.f32 %v348_v2, %v279_v1 }
 0x26f   :  { %388 = vmatmul.f32.gmra.mxu0 %v349_v3 }
 0x274   :  { %v351_v5 = vpop.f32.mrf.mxu3 }
 0x275   :  { %v352_v6 = vadd.f32 %v351_v5, %v284_v4 }
 0x277   :  { %391 = vmatmul.f32.gmra.mxu0 %v352_v6 }
 0x27c   :  { %v354_v11 = vpop.f32.mrf.mxu3 }
 0x27d   :  { %v355_v13 = vadd.f32 %v354_v11, %v289_v7 }
 0x27f   :  { %394 = vmatmul.f32.gmra.mxu0 %v355_v13 }
 0x2c4   :  { %v374_v14 = vpop.f32.mrf.mxu0 }
 0x2c5   :  { %v1051_v18 = vsub.f32 %v334_v22, %v374_v14 }
 0x2c7   :  { %v406_v20 = vmul.f32 %v1051_v18, %v1051_v18 }
 0x2c9   :  { %430 = vmatmul.f32.vlgmr.msrb.gmra.mxu1 %v406_v20 }
 0x2cc   :  { %v377_v21 = vpop.f32.mrf.mxu0 }
 0x2cd   :  { %v1055_v23 = vsub.f32 %v337_v28, %v377_v21 }
 0x2cf   :  { %v407_v24 = vmul.f32 %v1055_v23, %v1055_v23 }
 0x2d1   :  { %433 = vmatmul.f32.gmra.mxu1 %v407_v24 }
 0x2d4   :  { %v380_v25 = vpop.f32.mrf.mxu0 }
 0x2d5   :  { %v1059_v33 = vsub.f32 %v340_v31, %v380_v25 }
 0x2d7   :  { %v408_v34 = vmul.f32 %v1059_v33, %v1059_v33 }
 0x2d9   :  { %436 = vmatmul.f32.gmra.mxu1 %v408_v34 }
 0x2dc   :  { %v383_v35 = vpop.f32.mrf.mxu0 }
 0x2dd   :  { %v1063_v36 = vsub.f32 %v343_v61, %v383_v35 }
 0x2df   :  { %v409_v37 = vmul.f32 %v1063_v36, %v1063_v36 }
 0x2e1   :  { %439 = vmatmul.f32.gmra.mxu1 %v409_v37 }
 0x2e4   :  { %v386_v38 = vpop.f32.mrf.mxu0 }
 0x2e5   :  { %v1067_v39 = vsub.f32 %v346_v0, %v386_v38 }
 0x2e7   :  { %v410_v40 = vmul.f32 %v1067_v39, %v1067_v39 }
 0x2e9   :  { %442 = vmatmul.f32.gmra.mxu1 %v410_v40 }
 0x2ec   :  { %v389_v41 = vpop.f32.mrf.mxu0 }
 0x2ed   :  { %v1071_v42 = vsub.f32 %v349_v3, %v389_v41 }
 0x2ef   :  { %v411_v43 = vmul.f32 %v1071_v42, %v1071_v42 }
 0x2f1   :  { %445 = vmatmul.f32.vlgmr.msrb.gmra.mxu3 %v411_v43 }
 0x2f4   :  { %v392_v44 = vpop.f32.mrf.mxu0 }
 0x2f5   :  { %v1075_v45 = vsub.f32 %v352_v6, %v392_v44 }
 0x2f7   :  { %v412_v47 = vmul.f32 %v1075_v45, %v1075_v45 }
 0x2f9   :  { %448 = vmatmul.f32.gmra.mxu3 %v412_v47 }
 0x2fc   :  { %v395_v48 = vpop.f32.mrf.mxu0 }
 0x2fd   :  { %v1079_v50 = vsub.f32 %v355_v13, %v395_v48 }
 0x2ff   :  { %v413_v51 = vmul.f32 %v1079_v50, %v1079_v50 }
 0x301   :  { %451 = vmatmul.f32.gmra.mxu3 %v413_v51 }
 0x346   :  { %v431_v53 = vpop.f32.mrf.mxu1 }
 0x347   :  { %v1096_v12 = vadd.f32 1e-05, %v431_v53 }
 0x34e   :  { %v434_v54 = vpop.f32.mrf.mxu1 }
 0x34f   :  { %v1093_v10 = vadd.f32 1e-05, %v434_v54 }
 0x356   :  { %v437_v56 = vpop.f32.mrf.mxu1 }
 0x357   :  { %v1090_v55 = vadd.f32 1e-05, %v437_v56 }
 0x35e   :  { %v440_v57 = vpop.f32.mrf.mxu1 }
 0x35f   :  { %v1087_v46 = vadd.f32 1e-05, %v440_v57 }
 0x361   :  { %vm491_vm12 = vweird.f32 %v1087_v46 }
 0x366   :  { %v443_v59 = vpop.f32.mrf.mxu1 }
 0x367   :  { %v1085_v49 = vadd.f32 1e-05, %v443_v59 }
 0x369   :  { %vm501_vm10 = vweird.f32 %v1085_v49 }
 0x374   :  { %v446_v58 = vpop.f32.mrf.mxu3 }
 0x375   :  { %v1083_v52 = vadd.f32 1e-05, %v446_v58 }
 0x377   :  { %691 = vrsqrt.f32 %v1083_v52  ;;  %vm511_vm3 = vweird.f32 %v1083_v52 }
 0x378   :  { %693 = vrsqrt.f32 %v1085_v49 }
 0x379   :  { %695 = vrsqrt.f32 %v1087_v46 }
 0x37c   :  { %v449_v8 = vpop.f32.mrf.mxu3 }
 0x37d   :  { %v450_v9 = vadd.f32 1e-05, %v449_v8  ;;  %v1099_v15 = vpop.eup %691 }
 0x37e   :  { %v1102_v16 = vpop.eup %693  ;;  %v506_v19 = vmul.f32 %v1099_v15, %v1083_v52  ;;  %vm512_vm0 = vweird.f32 %v1099_v15 }
 0x37f   :  { %697 = vrsqrt.f32 %v450_v9  ;;  %v1104_v17 = vpop.eup %695  ;;  %v496_v29 = vmul.f32 %v1102_v16, %v1085_v49  ;;  %vm521_vm1 = vweird.f32 %v450_v9  ;;  %vm502_vm5 = vweird.f32 %v1102_v16  ;;  %vm1141_vm7 = vmor %vm511_vm3, %vm512_vm0 }
 0x380   :  { %699 = vrsqrt.f32 %v1090_v55  ;;  %v486_v31 = vmul.f32 %v1104_v17, %v1087_v46  ;;  %v507_v60 = vmul.f32 %v1099_v15, %v506_v19  ;;  %vm492_vm9 = vweird.f32 %v1104_v17  ;;  %vm503_vm11 = vmor %vm501_vm10, %vm502_vm5 }
 0x381   :  { %701 = vrsqrt.f32 %v1093_v10  ;;  %v497_v0 = vmul.f32 %v1102_v16, %v496_v29  ;;  %vm493_vm14 = vmor %vm491_vm12, %vm492_vm9  ;;  %vm461_vm5 = vweird.f32 %v1096_v12 }
 0x382   :  { %703 = vrsqrt.f32 %v1096_v12  ;;  %v487_v3 = vmul.f32 %v1104_v17, %v486_v31  ;;  %v508_v4 = vmul.f32 0.5, %v507_v60 }
 0x383   :  { %v498_v11 = vmul.f32 0.5, %v497_v0 }
 0x384   :  { %v452_v22 = vpop.f32.mrf.mxu3  ;;  %v488_v21 = vmul.f32 0.5, %v487_v3  ;;  %v509_v24 = vsub.f32 1.5, %v508_v4  ;;  %v567_v3 = vpop.permute.xlu1 %566 }
 0x385   :  { %v698_v26 = vpop.eup %697  ;;  %v453_v27 = vadd.f32 1e-05, %v452_v22  ;;  %v499_v37 = vsub.f32 1.5, %v498_v11 }
 0x386   :  { %v1109_v28 = vpop.eup %699  ;;  %v516_v30 = vmul.f32 %v698_v26, %v450_v9  ;;  %vm522_vm15 = vweird.f32 %v698_v26  ;;  %v489_v43 = vsub.f32 1.5, %v488_v21  ;;  %v510_v47 = vmul.f32 %v1099_v15, %v509_v24 }
 0x387   :  { %705 = vrsqrt.f32 %v453_v27  ;;  %v1115_v32 = vpop.eup %701  ;;  %v476_v62 = vmul.f32 %v1109_v28, %v1090_v55  ;;  %vm1134_vm4 = vmor %vm521_vm1, %vm522_vm15  ;;  %vm531_vm6 = vweird.f32 %v453_v27  ;;  %v500_v58 = vmul.f32 %v1102_v16, %v499_v37 }
 0x388   :  { %v517_v61 = vmul.f32 %v698_v26, %v516_v30  ;;  %v1120_v63 = vpop.eup %703  ;;  %v466_v2 = vmul.f32 %v1115_v32, %v1093_v10  ;;  %v514_v8 = vsel %vm1141_vm7, %v1099_v15, %v510_v47  ;;  %v490_v9 = vmul.f32 %v1104_v17, %v489_v43 }
 0x389   :  { %v456_v6 = vmul.f32 %v1120_v63, %v1096_v12  ;;  %v477_v7 = vmul.f32 %v1109_v28, %v476_v62  ;;  %vm482_vm13 = vweird.f32 %v1109_v28  ;;  %v540_v15 = vmul.f32 %v514_v8, %v1071_v42 }
 0x38a   :  { %v518_v1 = vmul.f32 0.5, %v517_v61  ;;  %v467_v20 = vmul.f32 %v1115_v32, %v466_v2  ;;  %vm481_vm15 = vweird.f32 %v1090_v55  ;;  %vm472_vm0 = vweird.f32 %v1115_v32 }
 0x38b   :  { %v457_v34 = vmul.f32 %v1120_v63, %v456_v6  ;;  %v478_v35 = vmul.f32 0.5, %v477_v7  ;;  %vm483_vm1 = vmor %vm481_vm15, %vm482_vm13  ;;  %vm462_vm3 = vweird.f32 %v1120_v63  ;;  %v548_v55 = vmax.f32 %v540_v15, 0.0  ;;  %v572_v6 = vpop.permute.xlu2 %571 }
 0x38c   :  { %v519_v13 = vsub.f32 1.5, %v518_v1  ;;  %v468_v41 = vmul.f32 0.5, %v467_v20  ;;  %vm579_vm7 = vcmask 523264  }
 0x38d   :  { %v706_v5 = vpop.eup %705  ;;  %v458_v48 = vmul.f32 0.5, %v457_v34  ;;  %v479_v51 = vsub.f32 1.5, %v478_v35 }
 0x38e   :  { %v526_v14 = vmul.f32 %v706_v5, %v453_v27  ;;  %v520_v40 = vmul.f32 %v698_v26, %v519_v13  ;;  %vm532_vm2 = vweird.f32 %v706_v5  ;;  %v469_v59 = vsub.f32 1.5, %v468_v41 }
 0x38f   :  { %vm533_vm8 = vmor %vm531_vm6, %vm532_vm2  ;;  %v459_v19 = vsub.f32 1.5, %v458_v48  ;;  %v504_v27 = vsel %vm503_vm11, %v1102_v16, %v500_v58  ;;  %v480_v49 = vmul.f32 %v1109_v28, %v479_v51  ;;  %vm471_vm2 = vweird.f32 %v1093_v10 }
 0x390   :  { %v527_v25 = vmul.f32 %v706_v5, %v526_v14  ;;  %v524_v56 = vsel %vm1134_vm4, %v698_v26, %v520_v40  ;;  %v539_v16 = vmul.f32 %v504_v27, %v1067_v39  ;;  %vm473_vm4 = vmor %vm471_vm2, %vm472_vm0 }
 0x391   :  { %v541_v26 = vmul.f32 %v524_v56, %v1075_v45  ;;  %v494_v45 = vsel %vm493_vm14, %v1104_v17, %v490_v9  ;;  %v484_v42 = vsel %vm483_vm1, %v1109_v28, %v480_v49  ;;  %v460_v30 = vmul.f32 %v1120_v63, %v459_v19  ;;  %vm463_vm6 = vmor %vm461_vm5, %vm462_vm3 }
 0x392   :  { %v528_v38 = vmul.f32 0.5, %v527_v25  ;;  %v538_v17 = vmul.f32 %v494_v45, %v1063_v36  ;;  %v547_v39 = vmax.f32 %v539_v16, 0.0  ;;  %v537_v60 = vmul.f32 %v484_v42, %v1059_v33  ;;  %v552_v33 = vld [vmem:[%s1200_s6 + $0x8] sm:$0xff] }
 0x393   :  { %v549_v46 = vmax.f32 %v541_v26, 0.0  ;;  %v464_v10 = vsel %vm463_vm6, %v1120_v63, %v460_v30  ;;  %v562_v63 = vpop.permute.xlu0 %561 }
 0x394   :  { %v529_v44 = vsub.f32 1.5, %v528_v38  ;;  %v546_v28 = vmax.f32 %v538_v17, 0.0  ;;  %v545_v62 = vmax.f32 %v537_v60, 0.0  ;;  %v535_v36 = vmul.f32 %v464_v10, %v1051_v18  ;;  %v553_v18 = vld [vmem:[%s1200_s6 + $0x10] sm:$0xff] }
 0x396   :  { %v530_v54 = vmul.f32 %v706_v5, %v529_v44  ;;  %v543_v12 = vmax.f32 %v535_v36, 0.0 }
 0x398   :  { %v534_v52 = vsel %vm533_vm8, %v706_v5, %v530_v54 }
 0x399   :  { %v542_v22 = vmul.f32 %v534_v52, %v1079_v50  ;;  %v470_v50 = vmul.f32 %v1115_v32, %v469_v59 }
 0x39b   :  { %v550_v29 = vmax.f32 %v542_v22, 0.0  ;;  %v474_v31 = vsel %vm473_vm4, %v1115_v32, %v470_v50  ;;  %v551_v32 = vld [vmem:[%s1200_s6] sm:$0xff]  ;;  %v577_v13 = vpop.permute.xlu0 %576 }
 0x39c   :  { %v536_v61 = vmul.f32 %v474_v31, %v1055_v23  ;;  %v554_v23 = vld [vmem:[%s1200_s6 + $0x18] sm:$0xff]  ;;  %s735_s6 = smov 128  }
 0x39d   :  { %600 = vmatpush.msrb.mxu2 %v550_v29 }
 0x39e   :  { %v544_v0 = vmax.f32 %v536_v61, 0.0 }
 0x39f   :  { %601 = vmatpush.msrb.mxu2 %v549_v46 }
 0x3a1   :  { %602 = vmatpush.msrb.mxu2 %v548_v55 }
 0x3a3   :  { %603 = vmatpush.msrb.mxu2 %v547_v39 }
 0x3a5   :  { %604 = vmatpush.msrb.mxu2 %v546_v28 }
 0x3a7   :  { %605 = vmatpush.msrb.mxu2 %v545_v62 }
 0x3a9   :  { %606 = vmatpush.msrb.mxu2 %v544_v0 }
 0x3ab   :  { %607 = vmatpush.msrb.mxu2 %v543_v12 }
 0x3ac   :  { %656 = vmatmul.msk.f32.vlgmr.msrb.gmra.mxu2 %vm579_vm7, %v551_v32 }
 0x3b4   :  { %657 = vmatmul.msk.f32.gmra.mxu2 %vm579_vm7, %v552_v33 }
 0x3bc   :  { %658 = vmatmul.msk.f32.gmra.mxu2 %vm579_vm7, %v553_v18 }
 0x3c4   :  { %659 = vmatmul.msk.f32.gmra.mxu2 %vm579_vm7, %v554_v23 }
 0x42f   :  { %v609_v1 = vpop.f32.mrf.mxu2 }
 0x430   :  { %v610_v2 = vadd.f32 %v609_v1, %v562_v63 }
 0x432   :  { %621 = vst [vmem:[#allocation2] sm:$0xff] %v610_v2 }
 0x437   :  { %v612_v4 = vpop.f32.mrf.mxu2 }
 0x438   :  { %v613_v5 = vadd.f32 %v612_v4, %v567_v3 }
 0x43a   :  { %622 = vst [vmem:[#allocation2 + $0x8] sm:$0xff] %v613_v5 }
 0x43f   :  { %v615_v7 = vpop.f32.mrf.mxu2 }
 0x440   :  { %v616_v11 = vadd.f32 %v615_v7, %v572_v6 }
 0x442   :  { %623 = vst [vmem:[#allocation2 + $0x10] sm:$0xff] %v616_v11 }
 0x447   :  { %v618_v14 = vpop.f32.mrf.mxu2 }
 0x448   :  { %v619_v20 = vadd.f32 %v618_v14, %v577_v13 }
 0x44a   :  { %624 = vst [vmem:[#allocation2 + $0x18] sm:$0xff] %v619_v20 }
 0x44b   :  { %637 = dma.vmem_to_hbm [thread:$0]  %s630_s2, 512, %s632_s25, [#allocation3], %s735_s6, %s735_s6, %s736_s26  }
 0x44c   :  { %731 = dma.done.wait [#allocation3], 512  }
 0x44d   :  { %732 = vsyncadd [#allocation3], 4294966784 }
 0x44e   :  { %642 = vsyncpa [#allocation3], 1 }

</bundles_post_ra>
